<compile_context>
chip_gen: v6e
topology: v6e:2x2x1
jax: 0.10.0
libtpu: 0.0.40
codegen_flags: <defaults>
</compile_context>

<pallas_src>
import functools

import numpy as np
import jax
import jax.numpy as jnp
from jax import lax
from jax.experimental import pallas as pl
from jax.experimental.pallas import tpu as pltpu

COMPUTE_DTYPE = jnp.bfloat16            # MXU operand dtype (accumulation stays f32)
VMEM_LIMIT = 48 * 1024 * 1024           # explicit scoped-VMEM budget (fits v5e/v6e/v7x)


# --------------------------------------------------------------------------
# 3x3 conv + folded BN + optional ReLU  (tiled, manual halo DMA, no im2col)
# --------------------------------------------------------------------------

def _conv3x3_kernel(x_hbm, w_ref, s_ref, b_ref, o_ref, xbuf, sem, *, relu):
    """One (sample, row-tile) step.

    x_hbm : (N, (H2+3)*Wp, Cin) spatially padded + flattened input, left in HBM.
    w_ref : (9, Cin, Cout) weights, tap-major, resident in VMEM.
    s_ref, b_ref : (1, Cout) folded BN scale / bias (f32).
    o_ref : (1, TH*Wp, Cout) output tile (garbage right-pad columns cropped on host).
    xbuf  : (2, (TH+3)*Wp, Cin) double-buffered VMEM scratch.
    """
    n = pl.program_id(0)
    t = pl.program_id(1)
    num_t = pl.num_programs(1)

    body = o_ref.shape[1]                 # TH * Wp
    chunk = xbuf.shape[1]                 # (TH + 3) * Wp
    wp = (chunk - body) // 3
    cout = o_ref.shape[2]
    slot = t % 2

    def start_fetch(tile, slot_idx):
        start = pl.multiple_of(tile * body, 8)
        pltpu.make_async_copy(
            x_hbm.at[n, pl.ds(start, chunk)],
            xbuf.at[slot_idx],
            sem.at[slot_idx],
        ).start()

    @pl.when(t == 0)
    def _():                               # prime the pipeline for this sample
        start_fetch(t, slot)

    @pl.when(t + 1 < num_t)
    def _():                               # prefetch the next row tile
        start_fetch(t + 1, 1 - slot)

    pltpu.make_async_copy(
        x_hbm.at[n, pl.ds(0, chunk)], xbuf.at[slot], sem.at[slot]
    ).wait()

    # 9 shifted matmuls over the flattened padded rows (in-VMEM "im2col").
    acc = jnp.zeros((body, cout), jnp.float32)
    for dy in range(3):
        for dx in range(3):
            off = dy * wp + dx
            patch = xbuf[slot, off:off + body, :]          # (TH*Wp, Cin) bf16
            acc = acc + lax.dot_general(
                patch, w_ref[dy * 3 + dx],
                dimension_numbers=(((1,), (0,)), ((), ())),
                preferred_element_type=jnp.float32)
    acc = acc * s_ref[0] + b_ref[0]
    if relu:
        acc = jnp.maximum(acc, 0.0)
    o_ref[0] = acc.astype(o_ref.dtype)


def _choose_row_tile(h, w, tile_rows):
    """Pick TH (multiple of 8 output rows per tile) so TH*W ~= tile_rows."""
    th = max(8, -(-tile_rows // w))
    th = ((th + 7) // 8) * 8
    h8 = ((h + 7) // 8) * 8
    th = min(th, h8)
    t_tiles = -(-h // th)
    return th, t_tiles, t_tiles * th


def conv3x3_bn_act(x, w, scale, bias, relu=True, tile_rows=512):
    """3x3 conv (pad=1, stride=1, no conv bias) + folded BN + optional ReLU.

    x: (N, H, W, Cin) NHWC;  w: (3, 3, Cin, Cout);  scale/bias: (Cout,)
    """
    n, h, wd, cin = x.shape
    cout = w.shape[-1]
    wp = wd + 2
    th, t_tiles, h2 = _choose_row_tile(h, wd, tile_rows)

    # zero pad: 1 top row, (h2-h)+2 bottom rows, 1 col each side; flatten spatially.
    xp = jnp.pad(x, ((0, 0), (1, h2 - h + 2), (1, 1), (0, 0))).astype(COMPUTE_DTYPE)
    xflat = xp.reshape(n, (h2 + 3) * wp, cin)
    wmat = w.reshape(9, cin, cout).astype(COMPUTE_DTYPE)
    sc = scale.reshape(1, cout).astype(jnp.float32)
    bi = bias.reshape(1, cout).astype(jnp.float32)
    chunk = (th + 3) * wp

    flops = 2 * n * h2 * wp * 9 * cin * cout
    bytes_accessed = int(xflat.size) * 2 + int(wmat.size) * 2 + n * h2 * wp * cout * 4

    out = pl.pallas_call(
        functools.partial(_conv3x3_kernel, relu=relu),
        out_shape=jax.ShapeDtypeStruct((n, h2 * wp, cout), jnp.float32),
        grid_spec=pltpu.PrefetchScalarGridSpec(
            num_scalar_prefetch=0,
            grid=(n, t_tiles),
            in_specs=[
                pl.BlockSpec(memory_space=pl.ANY),                 # padded input (HBM)
                pl.BlockSpec((9, cin, cout), lambda i, t: (0, 0, 0)),
                pl.BlockSpec((1, cout), lambda i, t: (0, 0)),
                pl.BlockSpec((1, cout), lambda i, t: (0, 0)),
            ],
            out_specs=pl.BlockSpec((1, th * wp, cout), lambda i, t: (i, t, 0)),
            scratch_shapes=[
                pltpu.VMEM((2, chunk, cin), COMPUTE_DTYPE),
                pltpu.SemaphoreType.DMA((2,)),
            ],
        ),
        compiler_params=pltpu.CompilerParams(
            dimension_semantics=("parallel", "arbitrary"),
            vmem_limit_bytes=VMEM_LIMIT,
        ),
        cost_estimate=pl.CostEstimate(
            flops=flops, transcendentals=0, bytes_accessed=bytes_accessed),
    )(xflat, wmat, sc, bi)

    # drop bottom padding rows and the garbage right-pad columns.
    return out.reshape(n, h2, wp, cout)[:, :h, :wd, :]


# --------------------------------------------------------------------------
# Separable bilinear upsample (align_corners=False)
# --------------------------------------------------------------------------

def _interp_matrix(out_size, in_size):
    """1-D bilinear interpolation matrix, PyTorch align_corners=False semantics."""
    scale = in_size / out_size
    idx = (np.arange(out_size, dtype=np.float64) + 0.5) * scale - 0.5
    idx = np.clip(idx, 0.0, None)
    i0 = np.clip(np.floor(idx).astype(np.int64), 0, in_size - 1)
    i1 = np.minimum(i0 + 1, in_size - 1)
    lam = idx - i0
    m = np.zeros((out_size, in_size), dtype=np.float32)
    m[np.arange(out_size), i0] += (1.0 - lam).astype(np.float32)
    m[np.arange(out_size), i1] += lam.astype(np.float32)
    return m


def _up_rows_kernel(m_ref, x_ref, o_ref):
    # (Ho, H) @ (H, W*C) -> (Ho, W*C)
    o_ref[0] = lax.dot_general(
        m_ref[...], x_ref[0],
        dimension_numbers=(((1,), (0,)), ((), ())),
        preferred_element_type=jnp.float32).astype(o_ref.dtype)


def _up_cols_kernel(m_ref, x_ref, o_ref):
    # batched over Ho: (Ho, Wo, W) x (Ho, W, C) -> (Ho, Wo, C)
    o_ref[0] = lax.dot_general(
        m_ref[...], x_ref[0],
        dimension_numbers=(((2,), (1,)), ((0,), (0,))),
        preferred_element_type=jnp.float32).astype(o_ref.dtype)


def upsample_bilinear(x, factor):
    """Bilinear upsample as two separable small matmuls (no dense kron matrix)."""
    if factor == 1:
        return x
    n, h, w, c = x.shape
    ho, wo = h * factor, w * factor
    my = jnp.asarray(_interp_matrix(ho, h)).astype(COMPUTE_DTYPE)        # (Ho, H)
    mx = jnp.asarray(_interp_matrix(wo, w)).astype(COMPUTE_DTYPE)        # (Wo, W)
    mxb = jnp.broadcast_to(mx, (ho, wo, w))                              # stays resident

    x1 = x.reshape(n, h, w * c).astype(COMPUTE_DTYPE)
    t1 = pl.pallas_call(
        _up_rows_kernel,
        out_shape=jax.ShapeDtypeStruct((n, ho, w * c), COMPUTE_DTYPE),
        grid=(n,),
        in_specs=[pl.BlockSpec((ho, h), lambda i: (0, 0)),
                  pl.BlockSpec((1, h, w * c), lambda i: (i, 0, 0))],
        out_specs=pl.BlockSpec((1, ho, w * c), lambda i: (i, 0, 0)),
        compiler_params=pltpu.CompilerParams(
            dimension_semantics=("parallel",), vmem_limit_bytes=VMEM_LIMIT),
    )(my, x1)

    t1 = t1.reshape(n, ho, w, c)
    out = pl.pallas_call(
        _up_cols_kernel,
        out_shape=jax.ShapeDtypeStruct((n, ho, wo, c), jnp.float32),
        grid=(n,),
        in_specs=[pl.BlockSpec((ho, wo, w), lambda i: (0, 0, 0)),
                  pl.BlockSpec((1, ho, w, c), lambda i: (i, 0, 0, 0))],
        out_specs=pl.BlockSpec((1, ho, wo, c), lambda i: (i, 0, 0, 0)),
        compiler_params=pltpu.CompilerParams(
            dimension_semantics=("parallel",), vmem_limit_bytes=VMEM_LIMIT),
    )(mxb, t1)
    return out


# --------------------------------------------------------------------------
# Fused UAFM attention path: stats -> conv(4->2) -> conv(2->1) -> sigmoid gate
# --------------------------------------------------------------------------

def _uafm_fuse_kernel(x_ref, s_ref, w1_ref, s1_ref, b1_ref, w2_ref, s2_ref, b2_ref,
                      o_ref):
    _, h, wd, _ = x_ref.shape
    xv = x_ref[0].astype(jnp.float32)      # (H, W, C)
    sv = s_ref[0].astype(jnp.float32)

    # cat([mean_c(x), max_c(x), mean_c(skip), max_c(skip)]) kept in vregs/VMEM
    stats = (
        jnp.mean(xv, axis=-1, keepdims=True),       # (H, W, 1)
        jnp.max(xv, axis=-1, keepdims=True),
        jnp.mean(sv, axis=-1, keepdims=True),
        jnp.max(sv, axis=-1, keepdims=True),
    )

    rix = lax.broadcasted_iota(jnp.int32, (h, wd, 1), 0)
    cix = lax.broadcasted_iota(jnp.int32, (h, wd, 1), 1)

    def shift(p, sy, sx):
        # zero-padded spatial shift: result[r, c] = p[r + sy, c + sx] (0 outside)
        q = p
        if sy != 0:
            q = pltpu.roll(q, shift=(-sy) % h, axis=0)
        if sx != 0:
            q = pltpu.roll(q, shift=(-sx) % wd, axis=1)
        valid = ((rix + sy >= 0) & (rix + sy < h) &
                 (cix + sx >= 0) & (cix + sx < wd))
        return jnp.where(valid, q, 0.0)

    # conv_atten[0]: 3x3, 4 -> 2, folded BN + ReLU (VPU multiply-adds, weights in SMEM)
    t0 = jnp.zeros((h, wd, 1), jnp.float32)
    t1 = jnp.zeros((h, wd, 1), jnp.float32)
    for dy in range(3):
        for dx in range(3):
            sh = [shift(stats[ci], dy - 1, dx - 1) for ci in range(4)]
            for ci in range(4):
                base = ((dy * 3 + dx) * 4 + ci) * 2
                t0 = t0 + sh[ci] * w1_ref[base + 0]
                t1 = t1 + sh[ci] * w1_ref[base + 1]
    t0 = jnp.maximum(t0 * s1_ref[0] + b1_ref[0], 0.0)
    t1 = jnp.maximum(t1 * s1_ref[1] + b1_ref[1], 0.0)

    # conv_atten[1]: 3x3, 2 -> 1, folded BN, no activation
    a = jnp.zeros((h, wd, 1), jnp.float32)
    for dy in range(3):
        for dx in range(3):
            k = (dy * 3 + dx) * 2
            a = a + shift(t0, dy - 1, dx - 1) * w2_ref[k + 0]
            a = a + shift(t1, dy - 1, dx - 1) * w2_ref[k + 1]
    a = a * s2_ref[0] + b2_ref[0]

    gate = jax.nn.sigmoid(a)                       # (H, W, 1); exp goes to the EUP
    out = xv * gate + sv * (1.0 - gate)
    o_ref[0] = out.astype(o_ref.dtype)


def uafm_attention_fuse(x, skip, atten1, atten2):
    n, h, wd, c = x.shape
    w1, s1, b1 = atten1
    w2, s2, b2 = atten2
    smem = pl.BlockSpec(memory_space=pltpu.MemorySpace.SMEM)
    return pl.pallas_call(
        _uafm_fuse_kernel,
        out_shape=jax.ShapeDtypeStruct((n, h, wd, c), jnp.float32),
        grid=(n,),
        in_specs=[
            pl.BlockSpec((1, h, wd, c), lambda i: (i, 0, 0, 0)),
            pl.BlockSpec((1, h, wd, c), lambda i: (i, 0, 0, 0)),
            smem, smem, smem, smem, smem, smem,
        ],
        out_specs=pl.BlockSpec((1, h, wd, c), lambda i: (i, 0, 0, 0)),
        compiler_params=pltpu.CompilerParams(
            dimension_semantics=("parallel",), vmem_limit_bytes=VMEM_LIMIT),
    )(x.astype(jnp.float32), skip.astype(jnp.float32),
      w1.reshape(-1).astype(jnp.float32), s1.astype(jnp.float32), b1.astype(jnp.float32),
      w2.reshape(-1).astype(jnp.float32), s2.astype(jnp.float32), b2.astype(jnp.float32))


# --------------------------------------------------------------------------
# Parameter init (deterministic, synthetic) and module forward
# --------------------------------------------------------------------------

def init_convbn(key, cin, cout, eps=1e-5):
    """ConvBNReLU params (conv bias=False): weight + folded eval-mode BN scale/bias."""
    kw, kg, kb, km, kv = jax.random.split(key, 5)
    w = jax.random.normal(kw, (3, 3, cin, cout), jnp.float32) / np.sqrt(9.0 * cin)
    gamma = 1.0 + 0.1 * jax.random.normal(kg, (cout,), jnp.float32)
    beta = 0.1 * jax.random.normal(kb, (cout,), jnp.float32)
    rmean = 0.1 * jax.random.normal(km, (cout,), jnp.float32)
    rvar = jnp.abs(jax.random.normal(kv, (cout,), jnp.float32)) + 1.0
    scale = gamma / jnp.sqrt(rvar + eps)
    bias = beta - rmean * scale
    return (w, scale, bias)


def init_decoder_params(key, encoder_channels, up_factors, out_channels):
    enc = list(encoder_channels)[::-1]
    in_ch = enc[0]
    stages = []
    for skip_ch, uf, out_ch in zip(enc[1:], up_factors, out_channels):
        key, k0, k1, k2, k3 = jax.random.split(key, 5)
        stage = {
            "up_factor": uf,
            "atten1": init_convbn(k0, 4, 2),          # ConvBNReLU(4, 2)
            "atten2": init_convbn(k1, 2, 1),          # ConvBNReLU(2, 1, no act)
            "conv_out": init_convbn(k2, in_ch, out_ch),
        }
        if skip_ch != in_ch:
            stage["proj_skip"] = init_convbn(k3, skip_ch, in_ch)
        stages.append(stage)
        in_ch = out_ch
    return stages


def uafm_forward(stage, x, skip, tile_rows):
    """UAFM forward. x, skip: NHWC."""
    if stage["up_factor"] != 1:
        x = upsample_bilinear(x, stage["up_factor"])
    if "proj_skip" in stage:
        skip = conv3x3_bn_act(skip, *stage["proj_skip"], relu=True, tile_rows=tile_rows)
    out = uafm_attention_fuse(x, skip, stage["atten1"], stage["atten2"])
    out = conv3x3_bn_act(out, *stage["conv_out"], relu=True, tile_rows=tile_rows)
    return out


def ppliteseg_decoder_forward(params, feats_nchw, tile_rows=512):
    """feats_nchw: list of NCHW features ordered shallow -> deep (PyTorch convention)."""
    feats = [jnp.transpose(f, (0, 2, 3, 1)) for f in feats_nchw]   # -> NHWC
    feats = feats[::-1]
    x = feats[0]
    for stage, skip in zip(params, feats[1:]):
        x = uafm_forward(stage, x, skip, tile_rows)
    return jnp.transpose(x, (0, 3, 1, 2))                          # back to NCHW


# --------------------------------------------------------------------------

if __name__ == "__main__":
    key = jax.random.PRNGKey(0)
    k1, k2, k3, kp = jax.random.split(key, 4)

    N = 2
    encoder_channels = [8, 16, 32]   # shallow -> deep
    up_factors = [2, 2]
    out_channels = [16, 8]

    feats = [
        jax.random.normal(k1, (N, 8, 16, 16), jnp.float32),   # shallow, high res
        jax.random.normal(k2, (N, 16, 8, 8), jnp.float32),
        jax.random.normal(k3, (N, 32, 4, 4), jnp.float32),    # deep, low res
    ]

    params = init_decoder_params(kp, encoder_channels, up_factors, out_channels)

    # tile_rows=128 so the 16x16 stage runs with 2 row tiles per sample, exercising
    # the halo DMA + double-buffered prefetch path (default 512 for real resolutions).
    out = ppliteseg_decoder_forward(params, feats, tile_rows=128)
    out = jax.block_until_ready(out)
    assert out.shape == (N, out_channels[-1], 16, 16), out.shape
    assert bool(jnp.all(jnp.isfinite(out)))
    print("KERNEL_OK")
</pallas_src>

<mosaic_0001>
module attributes {stable_mosaic.version = 11 : i64} {
  func.func @_up_rows_kernel(%arg0: i32, %arg1: memref<8x4xbf16, #tpu.memory_space<vmem>>, %arg2: memref<1x4x128xbf16, #tpu.memory_space<vmem>>, %arg3: memref<1x8x128xbf16, #tpu.memory_space<vmem>>) attributes {dimension_semantics = [#tpu.dimension_semantics<parallel>], iteration_bounds = array<i64: 2>, scalar_prefetch = 0 : i64, scratch_operands = 0 : i64, tpu.core_type = #tpu.core_type<tc>, window_params = [{pipeline_mode = #tpu.pipeline_mode<synchronous>, transform_indices = @transform_0, window_bounds = array<i64: 8, 4>}, {transform_indices = @transform_1, window_bounds = array<i64: 1, 4, 128>}, {transform_indices = @transform_2, window_bounds = array<i64: 1, 8, 128>}]} {
    %c0 = arith.constant 0 : index
    %c0_0 = arith.constant 0 : index
    %0 = vector.load %arg1[%c0, %c0_0] : memref<8x4xbf16, #tpu.memory_space<vmem>>, vector<8x4xbf16>
    %c0_1 = arith.constant 0 : index
    %c0_2 = arith.constant 0 : index
    %c0_3 = arith.constant 0 : index
    %1 = vector.load %arg2[%c0_1, %c0_2, %c0_3] : memref<1x4x128xbf16, #tpu.memory_space<vmem>>, vector<1x4x128xbf16>
    %2 = vector.shape_cast %1 : vector<1x4x128xbf16> to vector<4x128xbf16>
    %cst = arith.constant dense<0.000000e+00> : vector<8x128xf32>
    %3 = tpu.matmul %0, %2, %cst {dimension_numbers = #tpu.dot_dimension_numbers<[1], [0], [0], [1], [0, 0, 1, 1], [], []>} : vector<8x4xbf16>, vector<4x128xbf16>, vector<8x128xf32> -> vector<8x128xf32>
    %4 = arith.truncf %3 : vector<8x128xf32> to vector<8x128xbf16>
    %c0_4 = arith.constant 0 : index
    %c0_5 = arith.constant 0 : index
    %c0_6 = arith.constant 0 : index
    %5 = vector.load %arg3[%c0_4, %c0_5, %c0_6] : memref<1x8x128xbf16, #tpu.memory_space<vmem>>, vector<1x8x128xbf16>
    %6 = vector.shape_cast %5 : vector<1x8x128xbf16> to vector<8x128xbf16>
    %7 = vector.shape_cast %4 : vector<8x128xbf16> to vector<1x8x128xbf16>
    tpu.vector_store %arg3[%c0_4, %c0_5, %c0_6], %7 {strides = array<i32>} : memref<1x8x128xbf16, #tpu.memory_space<vmem>>, vector<1x8x128xbf16>,
    return
  }
  func.func @transform_0(%arg0: i32) -> (i32, i32) {
    %c0_i32 = arith.constant 0 : i32
    %c0_i32_0 = arith.constant 0 : i32
    %c0_i32_1 = arith.constant 0 : i32
    return %c0_i32, %c0_i32_0 : i32, i32
  }
  func.func @transform_1(%arg0: i32) -> (i32, i32, i32) {
    %c0_i32 = arith.constant 0 : i32
    %c0_i32_0 = arith.constant 0 : i32
    %c0_i32_1 = arith.constant 0 : i32
    return %arg0, %c0_i32, %c0_i32_0 : i32, i32, i32
  }
  func.func @transform_2(%arg0: i32) -> (i32, i32, i32) {
    %c0_i32 = arith.constant 0 : i32
    %c0_i32_0 = arith.constant 0 : i32
    %c0_i32_1 = arith.constant 0 : i32
    return %arg0, %c0_i32, %c0_i32_0 : i32, i32, i32
  }
}

</mosaic_0001>

<bundles_post_ra>
// kernel: tpu_custom_call.1
= control target key start
LH: loop header
LB: loop body
LE: loop exit
PB: predicated region body
PF: predicated region fallthrough
CT: control target
= control target key end

     0   :  { %7 = vsyncpa [#allocation3], 0  ;;  %s507_s0 = inlined_call_operand.vmem [shape: bf16[8,4], index: 0, kind: input, shape index: {}]   ;;  %s508_s1 = inlined_call_operand.vmem [shape: bf16[2,4,128], index: 1, kind: input, shape index: {}]   ;;  %s509_s2 = inlined_call_operand.hbm [shape: bf16[2,8,128], index: 2, kind: output, shape index: {}]  }
   0x1   :  { %9 = vsyncpa [#allocation3 + $0x1], 0  ;;  %s405_s9 = smov 0   ;;  %s407_s10 = smov 0  }
   0x2   :  { %s409_s11 = smov 0   ;;  %s411_s12 = smov 0  }
   0x3 LB: > { %s426_s13 = sadd.s32 4294967295, %s385_s12   ;;  %s265_s14 = sadd.s32 4294967294, %s385_s12   ;;  %s385_s12 = sphi %s411_s12, %s515_s12   ;;  %s381_s11 = sphi %s409_s11, %s514_s11   ;;  %s377_s10 = sphi %s407_s10, %s513_s10   ;;  %s373_s9 = sphi %s405_s9, %s512_s9  }
   0x4   : > { %s430_s15 = sadd.s32 1, %s385_s12   ;;  %s69_s16 = sadd.s32 1, %s381_s11 }
   0x5   : > { %s66_s17 = ssub.s32 %s385_s12, %s430_s15  ;;  %p79_p0 = scmp.ne.s32.totalorder %s381_s11, %s377_s10 }
   0x6   : > { %p67_p1 = scmp.eq.s32.totalorder %s66_s17, 0  ;;  %p80_p2 = scmp.eq.s32.totalorder %s426_s13, 1 }
   0x7   : > { %p85_p3 = scmp.ne.s32.totalorder %s377_s10, %s373_s9  ;;  %p86_p4 = scmp.eq.s32.totalorder %s265_s14, 1 }
   0x8   : > { %s441_s18 = scalar_select %p67_p1, %s381_s11, %s69_s16  }
   0x9   : > { %p443_p5 = por %p80_p2, %p79_p0  ;;  %p447_p6 = por %p86_p4, %p85_p3 }
   0xa   : > { %p268_p7 = scmp.ge.s32.totalorder %s385_s12, 1  ;;  %p114_p8 = scmp.lt.s32.totalorder %s385_s12, 3 }
   0xc   : > { %p115_p9 = pnand %p268_p7, %p114_p8 }
   0xd   : > { %p135_p10 = scmp.lt.s32.totalorder (!%p115_p9), %s426_s13, 1  ;;  %s132_s28 = sand.u32 (!%p115_p9), 1, %s377_s10  }
   0xe   : > { %118 = sbr.rel (%p115_p9) target bundleno = 237 (0xed), region = 28  ;;  %s269_s29 = sshll.u32 (!%p115_p9), %s132_s28, 2 }
   0xf   : > { %s273_s30 = sshll.u32 (!%p115_p9), %s426_s13, 6  ;;  %s134_s3 = scalar_lea.vmem (!%p115_p9), [#allocation2], %s269_s29 }
  0x10   : > { %s206_s4 = sshll.u32 (!%p115_p9), %s134_s3, 4  ;;  %s466_s7 = scalar_lea.hbm (!%p115_p9), %s509_s2, %s273_s30  ;;  %s468_s4 = int_to_ptr.vmem [resolvable:$true] %s206_s4 }
  0x11   : > { %s193_s8 = scalar_lea.sflag (!%p115_p9), [#allocation3], %s132_s28  ;;  %s325_s14 = scalar_lea.vmem (!%p115_p9), %s468_s4, 64 }
  0x12   : > { %p326_p11 = scmp.ne.s32.totalorder (!%p115_p9), %s468_s4, %s325_s14 }
  0x13   : > { %v387_v0 = vmov 0.0   ;;  %vm388_vm0 = vmmov 0   ;;  %s136_s21 = scalar_select %p135_p10, %s426_s13, 1  ;;  %vm146_vm1 = vcmask 1041408   ;;  %v140_v3 = vld [vmem:[%s507_s0] sm:$0xf] }
  0x14   : > { %278 = vmatprep.subr.bf16.mxu0 %v387_v0  ;;  %280 = vmatprep.mubr.msk.bf16.mxu0 %vm388_vm0, %v387_v0  ;;  %vm142_vm2 = vcmask 31744   ;;  %p327_p12 = pnand %p326_p11, %p443_p5  ;;  %s389_s13 = smov [#allocation2]  }
  0x15   : > { %s270_s22 = sshll.u32 %s136_s21, 1  ;;  %s329_s16 = sshll.u32 %s389_s13, 4  ;;  %s330_s16 = int_to_ptr.vmem [resolvable:$false] %s329_s16 }
  0x16   : > { %s138_s25 = scalar_lea.vmem %s508_s1, %s270_s22  ;;  %p328_p13 = pneg %p327_p12 }
  0x17   : > { %v141_v1 = vld [vmem:[%s138_s25] sm:$0x3]  ;;  %s331_s17 = scalar_lea.vmem %s330_s16, 128  ;;  %p332_p0 = scmp.lt.s32.totalorder %s468_s4, %s330_s16 }
  0x18   : > { %v148_v2 = vsel %vm146_vm1, %v141_v1, 0  ;;  %p333_p1 = scmp.lt.s32.totalorder %s331_s17, %s325_s14 }
  0x19   : > { %279 = vmatpush3.bf16.msra.mxu0 %v148_v2 }
  0x1a   : > { %p334_p2 = por %p333_p1, %p332_p0 }
  0x1c   : > { %281 = vmatmul.mubr.msk.bf16.vlgmr.msra.gmra.mxu0 %vm142_vm2, %v140_v3  ;;  %p335_p3 = pnand %p334_p2, %p328_p13 }
  0xdc   : > { %v184_v4 = vpop.f32.mrf.mxu0 }
  0xdd   : > { %v190_v5 = vpack.c.bf16 %v184_v4, %v184_v4 }
  0xde   : > { %v282_v6 = vpop.f32.mrf.mxu0 }
  0xdf   : > { %191 = vst [vmem:[%s134_s3] sm:$0xf] %v190_v5 }
  0xe0   : > { %v187_v7 = vpop.f32.mrf.mxu0 }
  0xe1   : > { %338 = shalt.err (!%p335_p3)
}
  0xe2   : > { %s339_s21 = scalar_lea.hbm %s466_s7, 64  ;;  %s343_s24 = scalar_lea.hbm %s509_s2, 128 }
  0xe3   : > { %p340_p4 = scmp.ne.s32.totalorder %s466_s7, %s339_s21  ;;  %p344_p9 = scmp.lt.s32.totalorder %s466_s7, %s509_s2 }
  0xe4   : > { %p345_p10 = scmp.lt.s32.totalorder %s343_s24, %s339_s21 }
  0xe5   : > { %p341_p7 = pnand %p340_p4, %p443_p5 }
  0xe6   : > { %p346_p11 = por %p345_p10, %p344_p9 }
  0xe7   : > { %p342_p8 = pneg %p341_p7 }
  0xe9   : > { %p347_p12 = pnand %p346_p11, %p342_p8 }
  0xeb   : > { %350 = shalt.err (!%p347_p12)
}
  0xec   : > { %284 = dma.vmem_to_hbm [thread:$0]  (%p443_p5), %s468_s4, 64, %s466_s7, %s193_s8   ;;  %v283_v8 = vpop.f32.mrf.mxu0 }
  0xed PF: > { %p290_p13 = scmp.ge.s32.totalorder %s385_s12, 2  ;;  %s218_s27 = sand.u32 1, %s373_s9  }
  0xee   : > { %s219_s28 = scalar_lea.sflag [#allocation3], %s218_s27 }
  0xef   : > { %p287_p0 = pnand %p290_p13, %p447_p6 }
  0xf1   : > { %p288_p1 = pneg %p287_p0 }
  0xf3   : > { %368 = dma.done.wait (%p288_p1), %s219_s28, 64  }
  0xf4   : > { %370 = vsyncadd (%p288_p1), %s219_s28, 4294967232  ;;  %p12_p2 = scmp.ge.s32.totalorder %s430_s15, 4   ;;  %s512_s9 = smov %s377_s10 }
  0xf5   : > { %s513_s10 = smov %s381_s11  ;;  %s514_s11 = smov %s441_s18 }
  0xf6   : > { %s515_s12 = smov %s430_s15  ;;  %14 = sbr.rel (!%p12_p2) target bundleno = 3 (0x3), region = 63 }
  0xfb   :  { %224 = vsyncpa [#allocation3], 1 }
  0xfc   :  { %226 = vsyncpa [#allocation3 + $0x1], 1 }

</bundles_post_ra>
